<compile_context>
chip_gen: v5e
topology: v5e:2x2
jax: 0.10.0
libtpu: 0.0.40
codegen_flags: <defaults>
</compile_context>

<pallas_src>
import jax
import jax.numpy as jnp
from jax import lax
from jax.experimental import pallas as pl
from jax.experimental.pallas import tpu as pltpu

# ----- small BERT-like config (toy test shapes) -----
BATCH = 2
SEQ = 8
HIDDEN = 32


def bert_pooler_kernel(x_ref, w_ref, b_ref, out_ref):
    """x_ref: (tile_b, H_in) [CLS] rows; w_ref: (H_out, H_in) torch layout;
    b_ref: (1, H_out); out_ref: (tile_b, H_out)."""
    x = x_ref[...]
    w = w_ref[...]
    # first_token @ W^T : contract x dim 1 with w dim 1 -- no transpose needed,
    # the MXU takes the [out, in] operand directly.  f32 accumulation.
    pooled = lax.dot_general(
        x, w,
        dimension_numbers=(((1,), (1,)), ((), ())),
        preferred_element_type=jnp.float32,
    )
    pooled = pooled + b_ref[...].astype(jnp.float32)   # bias add in f32 (VPU)
    out_ref[...] = jnp.tanh(pooled).astype(out_ref.dtype)  # tanh on EUP, f32


def bert_pooler(hidden_states, weight, bias, *, tile_b=None):
    """hidden_states: (B, S, H_in); weight: (H_out, H_in) torch [out, in];
    bias: (H_out,).  Returns (B, H_out) pooled output."""
    B, S, H_in = hidden_states.shape
    H_out, H_in_w = weight.shape
    assert H_in_w == H_in, "weight inner dim must match hidden size"

    # Only the [CLS] token is used: slice BEFORE the kernel so only B*H
    # elements are DMA'd into VMEM instead of the full (B, S, H) tensor.
    first = hidden_states[:, 0, :]                     # (B, H_in)
    b2d = bias.reshape(1, H_out)                       # proper 2-D TPU operand

    # Batch tile: full batch at toy sizes, 128 rows (>= 8 sublanes, MXU-dense)
    # at production sizes.  For v7x, re-derive against 64 MiB VMEM if H is
    # large enough for the weight + double-buffered activations to matter.
    if tile_b is None:
        tile_b = B if B < 128 else 128
    grid = (pl.cdiv(B, tile_b),)

    return pl.pallas_call(
        bert_pooler_kernel,
        out_shape=jax.ShapeDtypeStruct((B, H_out), hidden_states.dtype),
        grid=grid,
        in_specs=[
            # [CLS] rows: pipelined (double-buffered) over the batch grid.
            pl.BlockSpec((tile_b, H_in), lambda i: (i, 0)),
            # Weight: constant block index -> stays VMEM-resident across steps.
            pl.BlockSpec((H_out, H_in), lambda i: (0, 0)),
            # Bias: constant block index -> VMEM-resident.
            pl.BlockSpec((1, H_out), lambda i: (0, 0)),
        ],
        out_specs=pl.BlockSpec((tile_b, H_out), lambda i: (i, 0)),
        compiler_params=pltpu.CompilerParams(
            # Batch axis is independent -> shard across v7x's 2 TensorCores.
            dimension_semantics=("parallel",),
        ),
    )(first, weight, b2d)


def reference(hidden_states, weight, bias):
    """Plain-JAX reference mirroring the PyTorch module."""
    first = hidden_states[:, 0]
    return jnp.tanh(first @ weight.T + bias)


if __name__ == "__main__":
    key = jax.random.PRNGKey(0)
    k_x, k_w, k_b = jax.random.split(key, 3)

    hidden_states = jax.random.normal(k_x, (BATCH, SEQ, HIDDEN), jnp.float32)
    weight = 0.05 * jax.random.normal(k_w, (HIDDEN, HIDDEN), jnp.float32)  # [out, in]
    bias = 0.05 * jax.random.normal(k_b, (HIDDEN,), jnp.float32)

    out = bert_pooler(hidden_states, weight, bias)
    out = jax.block_until_ready(out)

    ref = reference(hidden_states, weight, bias)
    assert out.shape == (BATCH, HIDDEN)
    assert jnp.allclose(out, ref, rtol=1e-4, atol=1e-4), "mismatch vs. reference"

    print("KERNEL_OK")
</pallas_src>

<mosaic_0001>
module attributes {stable_mosaic.version = 11 : i64} {
  func.func @bert_pooler_kernel(%arg0: i32, %arg1: memref<2x32xf32, #tpu.memory_space<vmem>>, %arg2: memref<32x32xf32, #tpu.memory_space<vmem>>, %arg3: memref<1x32xf32, #tpu.memory_space<vmem>>, %arg4: memref<2x32xf32, #tpu.memory_space<vmem>>) attributes {dimension_semantics = [#tpu.dimension_semantics<parallel>], iteration_bounds = array<i64: 1>, scalar_prefetch = 0 : i64, scratch_operands = 0 : i64, tpu.core_type = #tpu.core_type<tc>, window_params = [{transform_indices = @transform_0, window_bounds = array<i64: 2, 32>}, {pipeline_mode = #tpu.pipeline_mode<synchronous>, transform_indices = @transform_1, window_bounds = array<i64: 32, 32>}, {pipeline_mode = #tpu.pipeline_mode<synchronous>, transform_indices = @transform_2, window_bounds = array<i64: 1, 32>}, {transform_indices = @transform_3, window_bounds = array<i64: 2, 32>}]} {
    %c0 = arith.constant 0 : index
    %c0_0 = arith.constant 0 : index
    %0 = vector.load %arg1[%c0, %c0_0] : memref<2x32xf32, #tpu.memory_space<vmem>>, vector<2x32xf32>
    %c0_1 = arith.constant 0 : index
    %c0_2 = arith.constant 0 : index
    %1 = vector.load %arg2[%c0_1, %c0_2] : memref<32x32xf32, #tpu.memory_space<vmem>>, vector<32x32xf32>
    %cst = arith.constant dense<0.000000e+00> : vector<2x32xf32>
    %2 = tpu.matmul %0, %1, %cst {dimension_numbers = #tpu.dot_dimension_numbers<[1], [1], [0], [0], [0, 0, 1, 0], [], []>} : vector<2x32xf32>, vector<32x32xf32>, vector<2x32xf32> -> vector<2x32xf32>
    %c0_3 = arith.constant 0 : index
    %c0_4 = arith.constant 0 : index
    %3 = vector.load %arg3[%c0_3, %c0_4] : memref<1x32xf32, #tpu.memory_space<vmem>>, vector<1x32xf32>
    %4 = vector.broadcast %3 : vector<1x32xf32> to vector<2x32xf32>
    %5 = arith.addf %2, %4 : vector<2x32xf32>
    %6 = math.tanh %5 : vector<2x32xf32>
    %c0_5 = arith.constant 0 : index
    %c0_6 = arith.constant 0 : index
    %7 = vector.load %arg4[%c0_5, %c0_6] : memref<2x32xf32, #tpu.memory_space<vmem>>, vector<2x32xf32>
    tpu.vector_store %arg4[%c0_5, %c0_6], %6 {strides = array<i32>} : memref<2x32xf32, #tpu.memory_space<vmem>>, vector<2x32xf32>,
    return
  }
  func.func @transform_0(%arg0: i32) -> (i32, i32) {
    %c0_i32 = arith.constant 0 : i32
    %c0_i32_0 = arith.constant 0 : i32
    return %arg0, %c0_i32 : i32, i32
  }
  func.func @transform_1(%arg0: i32) -> (i32, i32) {
    %c0_i32 = arith.constant 0 : i32
    %c0_i32_0 = arith.constant 0 : i32
    %c0_i32_1 = arith.constant 0 : i32
    return %c0_i32, %c0_i32_0 : i32, i32
  }
  func.func @transform_2(%arg0: i32) -> (i32, i32) {
    %c0_i32 = arith.constant 0 : i32
    %c0_i32_0 = arith.constant 0 : i32
    %c0_i32_1 = arith.constant 0 : i32
    return %c0_i32, %c0_i32_0 : i32, i32
  }
  func.func @transform_3(%arg0: i32) -> (i32, i32) {
    %c0_i32 = arith.constant 0 : i32
    %c0_i32_0 = arith.constant 0 : i32
    return %arg0, %c0_i32 : i32, i32
  }
}

</mosaic_0001>

<bundles_post_ra>
// kernel: tpu_custom_call.1
= control target key start
LH: loop header
LB: loop body
LE: loop exit
PB: predicated region body
PF: predicated region fallthrough
CT: control target
= control target key end

     0   :  { %8 = vsyncpa [#allocation3], 0  ;;  %s239_s0 = inlined_call_operand.hbm [shape: f32[2,32], index: 0, kind: input, shape index: {}]   ;;  %s240_s1 = inlined_call_operand.hbm [shape: f32[32,32], index: 1, kind: input, shape index: {}]   ;;  %s241_s2 = inlined_call_operand.vmem [shape: f32[1,32], index: 2, kind: input, shape index: {}]   ;;  %s242_s3 = inlined_call_operand.hbm [shape: f32[2,32], index: 3, kind: output, shape index: {}]  }
   0x1   :  { %9 = vsyncpa [#allocation6], 0 }
   0x2   :  { %10 = vsyncpa [#allocation4], 0  ;;  %s16_s14 = sshll.u32 %s239_s0, 4  ;;  %s202_s15 = smov [#allocation2]   ;;  %s17_s14 = int_to_ptr.hbm [resolvable:$true] %s16_s14 }
   0x3   :  { %s18_s16 = sshll.u32 %s202_s15, 4  ;;  %s26_s19 = sshll.u32 %s240_s1, 4  ;;  %s19_s16 = int_to_ptr.vmem [resolvable:$true] %s18_s16  ;;  %s27_s19 = int_to_ptr.hbm [resolvable:$true] %s26_s19 }
   0x4   :  { %21 = dma.hbm_to_vmem [thread:$0]  %s17_s14, 32, %s19_s16, [#allocation3]  }
   0x5   :  { %s203_s20 = smov [#allocation5]   ;;  %s204_s22 = smov 128  }
   0x6   :  { %s28_s21 = sshll.u32 %s203_s20, 4  ;;  %s205_s23 = smov 8   ;;  %s29_s21 = int_to_ptr.vmem [resolvable:$true] %s28_s21 }
   0x7   :  { %34 = dma.hbm_to_vmem [thread:$0]  %s27_s19, 512, %s29_s21, [#allocation6], %s204_s22, %s204_s22, %s205_s23  }
   0x8   :  { %196 = dma.done.wait [#allocation3], 32  }
   0x9   :  { %197 = vsyncadd [#allocation3], 4294967264 }
   0xa   :  { %198 = dma.done.wait [#allocation6], 512  }
   0xb   :  { %199 = vsyncadd [#allocation6], 4294966784  ;;  %vm54_vm0 = vcmask 261120   ;;  %v49_v0 = vld [vmem:[#allocation5 + $0x18] sm:$0xff]  ;;  %v48_v1 = vld [vmem:[#allocation5 + $0x10] sm:$0xff]  ;;  %s206_s24 = smov [#allocation7]  }
   0xc   :  { %111 = vmatpush.xpose.msk.msra.mxu0 %vm54_vm0, %v49_v0  ;;  %v47_v2 = vld [vmem:[#allocation5 + $0x8] sm:$0xff]  ;;  %v46_v3 = vld [vmem:[#allocation5] sm:$0xff]  ;;  %v45_v4 = vld [vmem:[#allocation2] sm:$0x3]  ;;  %s98_s25 = sshll.u32 %s206_s24, 4  ;;  %s100_s28 = sshll.u32 %s242_s3, 4  ;;  %s99_s25 = int_to_ptr.vmem [resolvable:$true] %s98_s25  ;;  %s101_s28 = int_to_ptr.hbm [resolvable:$true] %s100_s28 }
   0xd   :  { %v121_v5 = vld [vmem:[%s241_s2] ss:$0 sm:$0xff]  ;;  %vm91_vm1 = vcmask 254976  }
  0x10   :  { %112 = vmatpush.xpose.msk.msra.mxu0 %vm54_vm0, %v48_v1 }
  0x14   :  { %113 = vmatpush.xpose.msk.msra.mxu0 %vm54_vm0, %v47_v2 }
  0x18   :  { %114 = vmatpush.xpose.msk.msra.mxu0 %vm54_vm0, %v46_v3 }
  0x1b   :  { %115 = vmatmul.msk.f32.vlgmr.msra.gmra.mxu0 %vm54_vm0, %v45_v4 }
  0x98   :  { %v87_v6 = vpop.f32.mrf.mxu0 }
  0x99   :  { %v88_v7 = vadd.f32 %v121_v5, %v87_v6 }
  0x9b   :  { %122 = vtanh.f32 %v88_v7 }
  0xa1   :  { %v123_v8 = vpop.eup %122 }
  0xa2   :  { %92 = vst.msk [vmem:[#allocation7] sm:$0x3] %vm91_vm1, %v123_v8 }
  0xa3   :  { %103 = dma.vmem_to_hbm [thread:$0]  %s99_s25, 32, %s101_s28, [#allocation4]  }
  0xa4   :  { %200 = dma.done.wait [#allocation4], 32  }
  0xa5   :  { %201 = vsyncadd [#allocation4], 4294967264 }
  0xa6   :  { %108 = vsyncpa [#allocation3], 1 }
  0xa7   :  { %109 = vsyncpa [#allocation6], 1 }
  0xa8   :  { %110 = vsyncpa [#allocation4], 1 }

</bundles_post_ra>
